<compile_context>
chip_gen: v7x
topology: tpu7x:2x2x1
jax: 0.10.0
libtpu: 0.0.40
codegen_flags: <defaults>
</compile_context>

<pallas_src>
import functools
import math

import jax
import jax.numpy as jnp
from jax import lax
from jax.experimental import pallas as pl
from jax.experimental.pallas import tpu as pltpu


def _layer_norm(x, gamma, beta, eps=1e-12):
    # x: (T, H) f32; gamma/beta: (1, H) broadcast
    mean = jnp.mean(x, axis=-1, keepdims=True)
    var = jnp.mean((x - mean) ** 2, axis=-1, keepdims=True)
    return (x - mean) * lax.rsqrt(var + eps) * gamma + beta


def _gelu_exact(x):
    # nn.GELU() default = exact erf-based GELU (kept for semantic parity with PyTorch).
    return 0.5 * x * (1.0 + lax.erf(x / jnp.sqrt(2.0).astype(x.dtype)))


# --------------------------------------------------------------------------------------
# Stage 1: QKV projection, head-major outputs (relayout paid once per batch element).
# --------------------------------------------------------------------------------------
def qkv_project_kernel(x_ref, wq_ref, bq_ref, wk_ref, bk_ref, wv_ref, bv_ref,
                       q_out_ref, kt_out_ref, v_out_ref, *, num_heads, head_size):
    bf16 = jnp.bfloat16
    x = x_ref[0].astype(bf16)                                     # (S, H)

    def proj(w_ref, b_ref):
        return jnp.dot(x, w_ref[...],
                       preferred_element_type=jnp.float32) + b_ref[...]

    q2d = proj(wq_ref, bq_ref)                                    # (S, H) f32
    k2d = proj(wk_ref, bk_ref)
    v2d = proj(wv_ref, bv_ref)

    D = head_size
    heads = lambda t: [t[:, h * D:(h + 1) * D] for h in range(num_heads)]
    q_out_ref[0] = jnp.stack(heads(q2d), axis=0).astype(bf16)             # (NH, S, D)
    v_out_ref[0] = jnp.stack(heads(v2d), axis=0).astype(bf16)             # (NH, S, D)
    kt_out_ref[0] = jnp.stack([h.T for h in heads(k2d)], axis=0).astype(bf16)  # (NH, D, S)


# --------------------------------------------------------------------------------------
# Stage 2: attention + SelfOutput(+LN) + Intermediate(GELU) + Output(+LN) per q-tile.
# --------------------------------------------------------------------------------------
def attn_ffn_kernel(x_ref, q_ref, kt_ref, v_ref, mask_ref,
                    wo_ref, bo_ref, ln1_g_ref, ln1_b_ref,
                    wi_ref, bi_ref, wout_ref, bout_ref, ln2_g_ref, ln2_b_ref,
                    out_ref, *, num_heads, head_size):
    bf16 = jnp.bfloat16
    x_q = x_ref[0]                                                # (T, H) f32 residual
    q_h = q_ref[0]                                                # (NH, T, D) bf16
    kt_h = kt_ref[0]                                              # (NH, D, S) bf16
    v_h = v_ref[0]                                                # (NH, S, D) bf16

    # ---- Scaled-dot-product attention, all heads batched on the MXU ----
    scores = jnp.einsum("hqd,hds->hqs", q_h, kt_h,
                        preferred_element_type=jnp.float32)       # (NH, T, S)
    mask_bias = ((1.0 - mask_ref[...]) * -10000.0)[None]          # (1, 1, S)
    scores = scores * (1.0 / math.sqrt(head_size)) + mask_bias
    scores = scores - jnp.max(scores, axis=-1, keepdims=True)
    p = jnp.exp(scores)                                           # (NH, T, S) f32
    denom = jnp.sum(p, axis=-1, keepdims=True)                    # (NH, T, 1)
    # attention-probability dropout -> identity in eval mode
    ctx = jnp.einsum("hqs,hsd->hqd", p.astype(bf16), v_h,
                     preferred_element_type=jnp.float32)          # (NH, T, D)
    ctx = ctx * pl.reciprocal(denom, approx=True)                 # softmax denom on EUP

    # ---- BertSelfOutput: one lane concat, then dense (T,H)@(H,H) projection ----
    ctx2d = jnp.concatenate([ctx[h] for h in range(num_heads)], axis=-1)  # (T, H)
    so = jnp.dot(ctx2d.astype(bf16), wo_ref[...],
                 preferred_element_type=jnp.float32) + bo_ref[...]
    attn_out = _layer_norm(so + x_q, ln1_g_ref[...], ln1_b_ref[...])

    # ---- BertIntermediate (exact GELU) + BertOutput (+LN) ----
    inter = jnp.dot(attn_out.astype(bf16), wi_ref[...],
                    preferred_element_type=jnp.float32) + bi_ref[...]
    inter = _gelu_exact(inter).astype(bf16)                       # (T, 4H) bf16
    outp = jnp.dot(inter, wout_ref[...],
                   preferred_element_type=jnp.float32) + bout_ref[...]
    y = _layer_norm(outp + attn_out, ln2_g_ref[...], ln2_b_ref[...])

    out_ref[0] = y.astype(out_ref.dtype)


# --------------------------------------------------------------------------------------
# Wrapper
# --------------------------------------------------------------------------------------
def _pick_q_tile(S):
    """Largest friendly query tile: prefer 256/128, else largest multiple-of-8 divisor."""
    if S % 256 == 0:
        return 256
    if S % 128 == 0:
        return 128
    start = min(S, 256)
    start -= start % 8
    for t in range(start, 7, -8):
        if S % t == 0:
            return t
    return S  # last resort: full sequence (block == full dim, still legal)


def _device_vmem_bytes():
    try:
        info = pltpu.get_tpu_info()
        v = getattr(info, "vmem_capacity_bytes", None)
        if v:
            return int(v)
    except Exception:
        pass
    return 64 * 1024 * 1024  # conservative (v7x per-TensorCore)


def _clamp_vmem(estimate_bytes, dev_vmem):
    return int(min(dev_vmem, max(int(estimate_bytes), 16 * 1024 * 1024)))


def bert_layer(x, mask, params, *, num_heads, q_tile=None):
    """Fused BertLayer forward.  x: [B, S, H] f32, mask: [B, S] f32 (1 = keep)."""
    B, S, H = x.shape
    assert H % num_heads == 0
    D = H // num_heads
    if q_tile is None:
        q_tile = _pick_q_tile(S)
    assert S % q_tile == 0
    n_qt = S // q_tile

    (wq, bq, wk, bk, wv, bv, wo, bo, g1, b1, wi, bi, wout, bout, g2, b2) = params
    bf16 = jnp.bfloat16
    wq_b, wk_b, wv_b = wq.astype(bf16), wk.astype(bf16), wv.astype(bf16)
    wo_b, wi_b, wout_b = wo.astype(bf16), wi.astype(bf16), wout.astype(bf16)

    dev_vmem = _device_vmem_bytes()
    nbytes = lambda a: int(a.size) * a.dtype.itemsize

    # ---------------- Stage 1: QKV projection ----------------
    qkv_params = (wq_b, bq, wk_b, bk, wv_b, bv)

    def wspec1(a):
        nd = a.ndim
        # Block index never changes -> single-buffer the resident weight.
        return pl.BlockSpec(a.shape, lambda b: (0,) * nd, pipeline_mode=pl.Buffered(1))

    w1_bytes = sum(nbytes(a) for a in qkv_params)
    est1 = (w1_bytes
            + 2 * S * H * 4                 # x block (double-buffered)
            + 2 * 3 * S * H * 2 * 2         # 3 head-major outputs (dbl-buf, lane-pad fudge)
            + 4 * S * H * 4)                # f32 temporaries
    vmem1 = _clamp_vmem(2 * est1 + (8 << 20), dev_vmem)
    ce1 = pl.CostEstimate(flops=int(2 * B * S * H * 3 * H),
                          transcendentals=0,
                          bytes_accessed=int(nbytes(x) + w1_bytes + 3 * B * S * H * 2))

    q_hm, kt_hm, v_hm = pl.pallas_call(
        functools.partial(qkv_project_kernel, num_heads=num_heads, head_size=D),
        grid=(B,),
        in_specs=[
            pl.BlockSpec((1, S, H), lambda b: (b, 0, 0)),
            *[wspec1(a) for a in qkv_params],
        ],
        out_specs=(
            pl.BlockSpec((1, num_heads, S, D), lambda b: (b, 0, 0, 0)),
            pl.BlockSpec((1, num_heads, D, S), lambda b: (b, 0, 0, 0)),
            pl.BlockSpec((1, num_heads, S, D), lambda b: (b, 0, 0, 0)),
        ),
        out_shape=(
            jax.ShapeDtypeStruct((B, num_heads, S, D), bf16),
            jax.ShapeDtypeStruct((B, num_heads, D, S), bf16),
            jax.ShapeDtypeStruct((B, num_heads, S, D), bf16),
        ),
        compiler_params=pltpu.CompilerParams(
            dimension_semantics=("parallel",), vmem_limit_bytes=vmem1),
        cost_estimate=ce1,
    )(x, *qkv_params)

    # ---------------- Stage 2: attention + FFN ----------------
    main_params = (wo_b, bo, g1, b1, wi_b, bi, wout_b, bout, g2, b2)

    def wspec2(a):
        nd = a.ndim
        return pl.BlockSpec(a.shape, lambda b, q: (0,) * nd, pipeline_mode=pl.Buffered(1))

    w2_bytes = sum(nbytes(a) for a in main_params)
    act_bytes = 2 * (q_tile * H * 4                        # x tile
                     + num_heads * q_tile * D * 2 * 2      # q tile (lane-pad fudge)
                     + num_heads * D * S * 2               # K^T (lane-dense)
                     + num_heads * S * D * 2 * 2           # V (lane-pad fudge)
                     + q_tile * H * 4)                     # out tile
    tmp_bytes = (2 * num_heads * q_tile * S * 4            # scores + p
                 + 2 * num_heads * q_tile * D * 4          # ctx
                 + 4 * q_tile * H * 4                      # ctx2d / so / attn_out / y
                 + q_tile * 4 * H * (4 + 2))               # inter f32 + bf16
    vmem2 = _clamp_vmem(w2_bytes + act_bytes + 2 * tmp_bytes + (8 << 20), dev_vmem)
    ce2 = pl.CostEstimate(
        flops=int(B * S * (4 * S * H + 18 * H * H)),
        transcendentals=int(B * S * (num_heads * S + 4 * H)),
        bytes_accessed=int(2 * nbytes(x) + 3 * B * S * H * 2 + nbytes(mask) + w2_bytes))

    out = pl.pallas_call(
        functools.partial(attn_ffn_kernel, num_heads=num_heads, head_size=D),
        grid=(B, n_qt),
        in_specs=[
            pl.BlockSpec((1, q_tile, H), lambda b, q: (b, q, 0)),            # x tile
            pl.BlockSpec((1, num_heads, q_tile, D), lambda b, q: (b, 0, q, 0)),  # Q tile
            pl.BlockSpec((1, num_heads, D, S), lambda b, q: (b, 0, 0, 0)),   # K^T (per b)
            pl.BlockSpec((1, num_heads, S, D), lambda b, q: (b, 0, 0, 0)),   # V   (per b)
            pl.BlockSpec((1, S), lambda b, q: (b, 0)),                       # mask
            *[wspec2(a) for a in main_params],
        ],
        out_specs=pl.BlockSpec((1, q_tile, H), lambda b, q: (b, q, 0)),
        out_shape=jax.ShapeDtypeStruct((B, S, H), x.dtype),
        compiler_params=pltpu.CompilerParams(
            dimension_semantics=("parallel", "parallel"),   # megacore-safe: no carried state
            vmem_limit_bytes=vmem2),
        cost_estimate=ce2,
    )(x, q_hm, kt_hm, v_hm, mask, *main_params)
    return out


# --------------------------------------------------------------------------------------
# Parameters + pure-JAX reference
# --------------------------------------------------------------------------------------
def make_params(key, hidden_size):
    H = hidden_size
    keys = jax.random.split(key, 8)
    std = 0.02
    # weights are [in, out] (transposed nn.Linear convention)
    wq = jax.random.normal(keys[0], (H, H), jnp.float32) * std
    wk = jax.random.normal(keys[1], (H, H), jnp.float32) * std
    wv = jax.random.normal(keys[2], (H, H), jnp.float32) * std
    wo = jax.random.normal(keys[3], (H, H), jnp.float32) * std
    wi = jax.random.normal(keys[4], (H, 4 * H), jnp.float32) * std
    wout = jax.random.normal(keys[5], (4 * H, H), jnp.float32) * std
    bq = jax.random.normal(keys[6], (1, H), jnp.float32) * std
    bk = jnp.zeros((1, H), jnp.float32)
    bv = jax.random.normal(keys[7], (1, H), jnp.float32) * std
    bo = jnp.zeros((1, H), jnp.float32)
    bi = jnp.zeros((1, 4 * H), jnp.float32)
    bout = jnp.zeros((1, H), jnp.float32)
    g1 = jnp.ones((1, H), jnp.float32)
    b1 = jnp.zeros((1, H), jnp.float32)
    g2 = jnp.ones((1, H), jnp.float32)
    b2 = jnp.zeros((1, H), jnp.float32)
    return (wq, bq, wk, bk, wv, bv, wo, bo, g1, b1, wi, bi, wout, bout, g2, b2)


def bert_layer_ref(x, mask, params, *, num_heads):
    """Pure-JAX f32 reference (mirrors the PyTorch forward, dropout = identity)."""
    (wq, bq, wk, bk, wv, bv, wo, bo, g1, b1, wi, bi, wout, bout, g2, b2) = params
    B, S, H = x.shape
    D = H // num_heads

    def split_heads(t):  # (B,S,H) -> (B,NH,S,D)
        return t.reshape(B, S, num_heads, D).transpose(0, 2, 1, 3)

    q = split_heads(x @ wq + bq)
    k = split_heads(x @ wk + bk)
    v = split_heads(x @ wv + bv)
    scores = jnp.einsum("bhqd,bhkd->bhqk", q, k) / math.sqrt(D)
    bias = ((1.0 - mask) * -10000.0)[:, None, None, :]
    probs = jax.nn.softmax(scores + bias, axis=-1)
    ctx = jnp.einsum("bhqk,bhkd->bhqd", probs, v).transpose(0, 2, 1, 3).reshape(B, S, H)

    def ln(t, g, b):
        mu = t.mean(-1, keepdims=True)
        var = ((t - mu) ** 2).mean(-1, keepdims=True)
        return (t - mu) / jnp.sqrt(var + 1e-12) * g + b

    attn_out = ln(ctx @ wo + bo + x, g1, b1)
    inter = jax.nn.gelu(attn_out @ wi + bi, approximate=False)
    return ln(inter @ wout + bout + attn_out, g2, b2)


if __name__ == "__main__":
    B, S, H, NH = 2, 8, 32, 4
    key = jax.random.PRNGKey(0)
    k_x, k_p = jax.random.split(key)

    x = jax.random.normal(k_x, (B, S, H), jnp.float32)
    # mask: 1.0 for valid tokens, last two positions of batch 1 masked out
    mask = jnp.ones((B, S), jnp.float32).at[1, -2:].set(0.0)

    params = make_params(k_p, H)

    out = bert_layer(x, mask, params, num_heads=NH)
    out = jax.block_until_ready(out)

    ref = bert_layer_ref(x, mask, params, num_heads=NH)
    assert out.shape == (B, S, H)
    err = float(jnp.max(jnp.abs(out - ref)))
    # bf16 MXU matmuls + approx reciprocal -> looser tolerance than the f32 reference
    assert err < 5e-2, f"mismatch vs reference: max abs err {err}"

    print("KERNEL_OK")
</pallas_src>

<mosaic_0001>
module attributes {stable_mosaic.version = 11 : i64} {
  func.func @qkv_project_kernel(%arg0: i32, %arg1: memref<1x8x32xf32, #tpu.memory_space<vmem>>, %arg2: memref<32x32xbf16, #tpu.memory_space<vmem>>, %arg3: memref<1x32xf32, #tpu.memory_space<vmem>>, %arg4: memref<32x32xbf16, #tpu.memory_space<vmem>>, %arg5: memref<1x32xf32, #tpu.memory_space<vmem>>, %arg6: memref<32x32xbf16, #tpu.memory_space<vmem>>, %arg7: memref<1x32xf32, #tpu.memory_space<vmem>>, %arg8: memref<1x4x8x8xbf16, #tpu.memory_space<vmem>>, %arg9: memref<1x4x8x8xbf16, #tpu.memory_space<vmem>>, %arg10: memref<1x4x8x8xbf16, #tpu.memory_space<vmem>>) attributes {dimension_semantics = [#tpu.dimension_semantics<parallel>], iteration_bounds = array<i64: 2>, scalar_prefetch = 0 : i64, scratch_operands = 0 : i64, tpu.core_type = #tpu.core_type<tc>, window_params = [{transform_indices = @transform_0, window_bounds = array<i64: 1, 8, 32>}, {pipeline_mode = #tpu.pipeline_mode<synchronous>, transform_indices = @transform_1, window_bounds = array<i64: 32, 32>}, {pipeline_mode = #tpu.pipeline_mode<synchronous>, transform_indices = @transform_2, window_bounds = array<i64: 1, 32>}, {pipeline_mode = #tpu.pipeline_mode<synchronous>, transform_indices = @transform_3, window_bounds = array<i64: 32, 32>}, {pipeline_mode = #tpu.pipeline_mode<synchronous>, transform_indices = @transform_4, window_bounds = array<i64: 1, 32>}, {pipeline_mode = #tpu.pipeline_mode<synchronous>, transform_indices = @transform_5, window_bounds = array<i64: 32, 32>}, {pipeline_mode = #tpu.pipeline_mode<synchronous>, transform_indices = @transform_6, window_bounds = array<i64: 1, 32>}, {transform_indices = @transform_7, window_bounds = array<i64: 1, 4, 8, 8>}, {transform_indices = @transform_8, window_bounds = array<i64: 1, 4, 8, 8>}, {transform_indices = @transform_9, window_bounds = array<i64: 1, 4, 8, 8>}]} {
    %c0 = arith.constant 0 : index
    %c0_0 = arith.constant 0 : index
    %c0_1 = arith.constant 0 : index
    %0 = vector.load %arg1[%c0, %c0_0, %c0_1] : memref<1x8x32xf32, #tpu.memory_space<vmem>>, vector<1x8x32xf32>
    %1 = vector.shape_cast %0 : vector<1x8x32xf32> to vector<8x32xf32>
    %2 = arith.truncf %1 : vector<8x32xf32> to vector<8x32xbf16>
    %c0_2 = arith.constant 0 : index
    %c0_3 = arith.constant 0 : index
    %3 = vector.load %arg2[%c0_2, %c0_3] : memref<32x32xbf16, #tpu.memory_space<vmem>>, vector<32x32xbf16>
    %cst = arith.constant dense<0.000000e+00> : vector<8x32xf32>
    %4 = tpu.matmul %2, %3, %cst {dimension_numbers = #tpu.dot_dimension_numbers<[1], [0], [0], [1], [0, 0, 1, 1], [], []>} : vector<8x32xbf16>, vector<32x32xbf16>, vector<8x32xf32> -> vector<8x32xf32>
    %c0_4 = arith.constant 0 : index
    %c0_5 = arith.constant 0 : index
    %5 = vector.load %arg3[%c0_4, %c0_5] : memref<1x32xf32, #tpu.memory_space<vmem>>, vector<1x32xf32>
    %6 = vector.broadcast %5 : vector<1x32xf32> to vector<8x32xf32>
    %7 = arith.addf %4, %6 : vector<8x32xf32>
    %c0_6 = arith.constant 0 : index
    %c0_7 = arith.constant 0 : index
    %8 = vector.load %arg4[%c0_6, %c0_7] : memref<32x32xbf16, #tpu.memory_space<vmem>>, vector<32x32xbf16>
    %cst_8 = arith.constant dense<0.000000e+00> : vector<8x32xf32>
    %9 = tpu.matmul %2, %8, %cst_8 {dimension_numbers = #tpu.dot_dimension_numbers<[1], [0], [0], [1], [0, 0, 1, 1], [], []>} : vector<8x32xbf16>, vector<32x32xbf16>, vector<8x32xf32> -> vector<8x32xf32>
    %c0_9 = arith.constant 0 : index
    %c0_10 = arith.constant 0 : index
    %10 = vector.load %arg5[%c0_9, %c0_10] : memref<1x32xf32, #tpu.memory_space<vmem>>, vector<1x32xf32>
    %11 = vector.broadcast %10 : vector<1x32xf32> to vector<8x32xf32>
    %12 = arith.addf %9, %11 : vector<8x32xf32>
    %c0_11 = arith.constant 0 : index
    %c0_12 = arith.constant 0 : index
    %13 = vector.load %arg6[%c0_11, %c0_12] : memref<32x32xbf16, #tpu.memory_space<vmem>>, vector<32x32xbf16>
    %cst_13 = arith.constant dense<0.000000e+00> : vector<8x32xf32>
    %14 = tpu.matmul %2, %13, %cst_13 {dimension_numbers = #tpu.dot_dimension_numbers<[1], [0], [0], [1], [0, 0, 1, 1], [], []>} : vector<8x32xbf16>, vector<32x32xbf16>, vector<8x32xf32> -> vector<8x32xf32>
    %c0_14 = arith.constant 0 : index
    %c0_15 = arith.constant 0 : index
    %15 = vector.load %arg7[%c0_14, %c0_15] : memref<1x32xf32, #tpu.memory_space<vmem>>, vector<1x32xf32>
    %16 = vector.broadcast %15 : vector<1x32xf32> to vector<8x32xf32>
    %17 = arith.addf %14, %16 : vector<8x32xf32>
    %18 = vector.extract_strided_slice %7 {offsets = [0, 0], sizes = [8, 8], strides = [1, 1]} : vector<8x32xf32> to vector<8x8xf32>
    %19 = vector.extract_strided_slice %7 {offsets = [0, 8], sizes = [8, 8], strides = [1, 1]} : vector<8x32xf32> to vector<8x8xf32>
    %20 = vector.extract_strided_slice %7 {offsets = [0, 16], sizes = [8, 8], strides = [1, 1]} : vector<8x32xf32> to vector<8x8xf32>
    %21 = vector.extract_strided_slice %7 {offsets = [0, 24], sizes = [8, 8], strides = [1, 1]} : vector<8x32xf32> to vector<8x8xf32>
    %22 = vector.shape_cast %18 : vector<8x8xf32> to vector<1x8x8xf32>
    %23 = vector.shape_cast %19 : vector<8x8xf32> to vector<1x8x8xf32>
    %24 = vector.shape_cast %20 : vector<8x8xf32> to vector<1x8x8xf32>
    %25 = vector.shape_cast %21 : vector<8x8xf32> to vector<1x8x8xf32>
    %26 = tpu.concatenate %22, %23, %24, %25 in 0 : vector<1x8x8xf32>, vector<1x8x8xf32>, vector<1x8x8xf32>, vector<1x8x8xf32> -> vector<4x8x8xf32>
    %27 = arith.truncf %26 : vector<4x8x8xf32> to vector<4x8x8xbf16>
    %c0_16 = arith.constant 0 : index
    %c0_17 = arith.constant 0 : index
    %c0_18 = arith.constant 0 : index
    %c0_19 = arith.constant 0 : index
    %28 = vector.load %arg8[%c0_16, %c0_17, %c0_18, %c0_19] : memref<1x4x8x8xbf16, #tpu.memory_space<vmem>>, vector<1x4x8x8xbf16>
    %29 = vector.shape_cast %28 : vector<1x4x8x8xbf16> to vector<4x8x8xbf16>
    %30 = vector.shape_cast %27 : vector<4x8x8xbf16> to vector<1x4x8x8xbf16>
    tpu.vector_store %arg8[%c0_16, %c0_17, %c0_18, %c0_19], %30 {strides = array<i32>} : memref<1x4x8x8xbf16, #tpu.memory_space<vmem>>, vector<1x4x8x8xbf16>,
    %31 = vector.extract_strided_slice %17 {offsets = [0, 0], sizes = [8, 8], strides = [1, 1]} : vector<8x32xf32> to vector<8x8xf32>
    %32 = vector.extract_strided_slice %17 {offsets = [0, 8], sizes = [8, 8], strides = [1, 1]} : vector<8x32xf32> to vector<8x8xf32>
    %33 = vector.extract_strided_slice %17 {offsets = [0, 16], sizes = [8, 8], strides = [1, 1]} : vector<8x32xf32> to vector<8x8xf32>
    %34 = vector.extract_strided_slice %17 {offsets = [0, 24], sizes = [8, 8], strides = [1, 1]} : vector<8x32xf32> to vector<8x8xf32>
    %35 = vector.shape_cast %31 : vector<8x8xf32> to vector<1x8x8xf32>
    %36 = vector.shape_cast %32 : vector<8x8xf32> to vector<1x8x8xf32>
    %37 = vector.shape_cast %33 : vector<8x8xf32> to vector<1x8x8xf32>
    %38 = vector.shape_cast %34 : vector<8x8xf32> to vector<1x8x8xf32>
    %39 = tpu.concatenate %35, %36, %37, %38 in 0 : vector<1x8x8xf32>, vector<1x8x8xf32>, vector<1x8x8xf32>, vector<1x8x8xf32> -> vector<4x8x8xf32>
    %40 = arith.truncf %39 : vector<4x8x8xf32> to vector<4x8x8xbf16>
    %c0_20 = arith.constant 0 : index
    %c0_21 = arith.constant 0 : index
    %c0_22 = arith.constant 0 : index
    %c0_23 = arith.constant 0 : index
    %41 = vector.load %arg10[%c0_20, %c0_21, %c0_22, %c0_23] : memref<1x4x8x8xbf16, #tpu.memory_space<vmem>>, vector<1x4x8x8xbf16>
    %42 = vector.shape_cast %41 : vector<1x4x8x8xbf16> to vector<4x8x8xbf16>
    %43 = vector.shape_cast %40 : vector<4x8x8xbf16> to vector<1x4x8x8xbf16>
    tpu.vector_store %arg10[%c0_20, %c0_21, %c0_22, %c0_23], %43 {strides = array<i32>} : memref<1x4x8x8xbf16, #tpu.memory_space<vmem>>, vector<1x4x8x8xbf16>,
    %44 = vector.extract_strided_slice %12 {offsets = [0, 0], sizes = [8, 8], strides = [1, 1]} : vector<8x32xf32> to vector<8x8xf32>
    %45 = vector.extract_strided_slice %12 {offsets = [0, 8], sizes = [8, 8], strides = [1, 1]} : vector<8x32xf32> to vector<8x8xf32>
    %46 = vector.extract_strided_slice %12 {offsets = [0, 16], sizes = [8, 8], strides = [1, 1]} : vector<8x32xf32> to vector<8x8xf32>
    %47 = vector.extract_strided_slice %12 {offsets = [0, 24], sizes = [8, 8], strides = [1, 1]} : vector<8x32xf32> to vector<8x8xf32>
    %48 = tpu.transpose %44, [1, 0] : vector<8x8xf32> -> vector<8x8xf32>
    %49 = tpu.transpose %45, [1, 0] : vector<8x8xf32> -> vector<8x8xf32>
    %50 = tpu.transpose %46, [1, 0] : vector<8x8xf32> -> vector<8x8xf32>
    %51 = tpu.transpose %47, [1, 0] : vector<8x8xf32> -> vector<8x8xf32>
    %52 = vector.shape_cast %48 : vector<8x8xf32> to vector<1x8x8xf32>
    %53 = vector.shape_cast %49 : vector<8x8xf32> to vector<1x8x8xf32>
    %54 = vector.shape_cast %50 : vector<8x8xf32> to vector<1x8x8xf32>
    %55 = vector.shape_cast %51 : vector<8x8xf32> to vector<1x8x8xf32>
    %56 = tpu.concatenate %52, %53, %54, %55 in 0 : vector<1x8x8xf32>, vector<1x8x8xf32>, vector<1x8x8xf32>, vector<1x8x8xf32> -> vector<4x8x8xf32>
    %57 = arith.truncf %56 : vector<4x8x8xf32> to vector<4x8x8xbf16>
    %c0_24 = arith.constant 0 : index
    %c0_25 = arith.constant 0 : index
    %c0_26 = arith.constant 0 : index
    %c0_27 = arith.constant 0 : index
    %58 = vector.load %arg9[%c0_24, %c0_25, %c0_26, %c0_27] : memref<1x4x8x8xbf16, #tpu.memory_space<vmem>>, vector<1x4x8x8xbf16>
    %59 = vector.shape_cast %58 : vector<1x4x8x8xbf16> to vector<4x8x8xbf16>
    %60 = vector.shape_cast %57 : vector<4x8x8xbf16> to vector<1x4x8x8xbf16>
    tpu.vector_store %arg9[%c0_24, %c0_25, %c0_26, %c0_27], %60 {strides = array<i32>} : memref<1x4x8x8xbf16, #tpu.memory_space<vmem>>, vector<1x4x8x8xbf16>,
    return
  }
  func.func @transform_0(%arg0: i32) -> (i32, i32, i32) {
    %c0_i32 = arith.constant 0 : i32
    %c0_i32_0 = arith.constant 0 : i32
    %c0_i32_1 = arith.constant 0 : i32
    return %arg0, %c0_i32, %c0_i32_0 : i32, i32, i32
  }
  func.func @transform_1(%arg0: i32) -> (i32, i32) {
    %c0_i32 = arith.constant 0 : i32
    %c0_i32_0 = arith.constant 0 : i32
    %c0_i32_1 = arith.constant 0 : i32
    return %c0_i32, %c0_i32_0 : i32, i32
  }
  func.func @transform_2(%arg0: i32) -> (i32, i32) {
    %c0_i32 = arith.constant 0 : i32
    %c0_i32_0 = arith.constant 0 : i32
    %c0_i32_1 = arith.constant 0 : i32
    return %c0_i32, %c0_i32_0 : i32, i32
  }
  func.func @transform_3(%arg0: i32) -> (i32, i32) {
    %c0_i32 = arith.constant 0 : i32
    %c0_i32_0 = arith.constant 0 : i32
    %c0_i32_1 = arith.constant 0 : i32
    return %c0_i32, %c0_i32_0 : i32, i32
  }
  func.func @transform_4(%arg0: i32) -> (i32, i32) {
    %c0_i32 = arith.constant 0 : i32
    %c0_i32_0 = arith.constant 0 : i32
    %c0_i32_1 = arith.constant 0 : i32
    return %c0_i32, %c0_i32_0 : i32, i32
  }
  func.func @transform_5(%arg0: i32) -> (i32, i32) {
    %c0_i32 = arith.constant 0 : i32
    %c0_i32_0 = arith.constant 0 : i32
    %c0_i32_1 = arith.constant 0 : i32
    return %c0_i32, %c0_i32_0 : i32, i32
  }
  func.func @transform_6(%arg0: i32) -> (i32, i32) {
    %c0_i32 = arith.constant 0 : i32
    %c0_i32_0 = arith.constant 0 : i32
    %c0_i32_1 = arith.constant 0 : i32
    return %c0_i32, %c0_i32_0 : i32, i32
  }
  func.func @transform_7(%arg0: i32) -> (i32, i32, i32, i32) {
    %c0_i32 = arith.constant 0 : i32
    %c0_i32_0 = arith.constant 0 : i32
    %c0_i32_1 = arith.constant 0 : i32
    %c0_i32_2 = arith.constant 0 : i32
    return %arg0, %c0_i32, %c0_i32_0, %c0_i32_1 : i32, i32, i32, i32
  }
  func.func @transform_8(%arg0: i32) -> (i32, i32, i32, i32) {
    %c0_i32 = arith.constant 0 : i32
    %c0_i32_0 = arith.constant 0 : i32
    %c0_i32_1 = arith.constant 0 : i32
    %c0_i32_2 = arith.constant 0 : i32
    return %arg0, %c0_i32, %c0_i32_0, %c0_i32_1 : i32, i32, i32, i32
  }
  func.func @transform_9(%arg0: i32) -> (i32, i32, i32, i32) {
    %c0_i32 = arith.constant 0 : i32
    %c0_i32_0 = arith.constant 0 : i32
    %c0_i32_1 = arith.constant 0 : i32
    %c0_i32_2 = arith.constant 0 : i32
    return %arg0, %c0_i32, %c0_i32_0, %c0_i32_1 : i32, i32, i32, i32
  }
}

</mosaic_0001>

<bundles_post_ra>
// kernel: tpu_custom_call.1
= control target key start
LH: loop header
LB: loop body
LE: loop exit
PB: predicated region body
PF: predicated region fallthrough
CT: control target
= control target key end

     0   :  { %s1820_s0 = inlined_call_operand.hbm [shape: f32[2,8,32], index: 0, kind: input, shape index: {}]   ;;  %s1821_s1 = inlined_call_operand.hbm [shape: bf16[32,32], index: 1, kind: input, shape index: {}]   ;;  %s1822_s2 = inlined_call_operand.vmem [shape: f32[1,32], index: 2, kind: input, shape index: {}]   ;;  %s1823_s3 = inlined_call_operand.hbm [shape: bf16[32,32], index: 3, kind: input, shape index: {}]   ;;  %s1824_s4 = inlined_call_operand.vmem [shape: f32[1,32], index: 4, kind: input, shape index: {}]   ;;  %s1825_s5 = inlined_call_operand.vmem [shape: bf16[32,32], index: 5, kind: input, shape index: {}]   ;;  %s1826_s6 = inlined_call_operand.vmem [shape: f32[1,32], index: 6, kind: input, shape index: {}]   ;;  %s1827_s7 = inlined_call_operand.hbm [shape: bf16[2,4,8,8], index: 7, kind: output, shape index: {0}]   ;;  %s1828_s8 = inlined_call_operand.hbm [shape: bf16[2,4,8,8], index: 8, kind: output, shape index: {1}]   ;;  %s1829_s9 = inlined_call_operand.hbm [shape: bf16[2,4,8,8], index: 9, kind: output, shape index: {2}]  }
   0x1   :  { %1837 = sst [smem:[#allocation17_spill]] %s1820_s0 }
   0x2   :  { %15 = vsyncpa [#allocation3], 0 }
   0x3   :  { %17 = vsyncpa [#allocation3 + $0x1], 0 }
   0x4   :  { %18 = vsyncpa [#allocation6], 0 }
   0x5   :  { %19 = vsyncpa [#allocation4], 0 }
   0x6   :  { %21 = vsyncpa [#allocation4 + $0x1], 0 }
   0x7   :  { %22 = vsyncpa [#allocation10], 0 }
   0x8   :  { %24 = vsyncpa [#allocation10 + $0x1], 0  ;;  %s1453_s30 = smov 0   ;;  %s1455_s10 = smov 0  }
   0x9   :  { %s1457_s11 = smov 0   ;;  %s1459_s12 = smov 0  }
   0xa LB: > { %s1474_s13 = sadd.s32 4294967295, %s1386_s12   ;;  %s1831_s14 = sadd.s32 4294967294, %s1386_s12   ;;  %s1386_s12 = sphi %s1459_s12, %s1860_s12   ;;  %s1382_s11 = sphi %s1457_s11, %s1859_s11   ;;  %s1378_s10 = sphi %s1455_s10, %s1858_s10   ;;  %s1374_s30 = sphi %s1453_s30, %s1857_s30  }
   0xb   : > { %p50_p0 = scmp.ne.s32.totalorder %s1378_s10, %s1374_s30  ;;  %p1830_p1 = scmp.eq.s32.totalorder %s1474_s13, 0 }
   0xc   : > { %p206_p3 = scmp.eq.s32.totalorder %s1831_s14, 1  ;;  %p984_p5 = scmp.ge.s32.totalorder %s1386_s12, 1 }
   0xd   : > { %p1485_p4 = por %p1830_p1, %p50_p0  ;;  %p265_p7 = scmp.lt.s32.totalorder %s1386_s12, 3 }
   0xe   : > { %p1490_p6 = por %p206_p3, %p50_p0  ;;  %s1388_s18 = smov [#allocation5]  }
   0xf   : > { %s1838_s15 = scalar_select %p1485_p4, 1, 0 }
  0x10   : > { %s1839_s16 = scalar_select %p1490_p6, 1, 0 }
  0x11   : > { %p1495_p8 = pnand %p984_p5, %p265_p7  ;;  %s277_s19 = sshll.u32 %s1388_s18, 4  ;;  %s1499_s19 = int_to_ptr.vmem [resolvable:$true] %s277_s19 }
  0x12   : > { %1840 = sst [smem:[#allocation16_spill]] %s1839_s16  ;;  %s1389_s21 = smov [#allocation7]  }
  0x13   : > { %p1072_p9 = pneg %p1495_p8  ;;  %s293_s22 = sshll.u32 %s1389_s21, 4  ;;  %s1510_s22 = int_to_ptr.vmem [resolvable:$true] %s293_s22 }
  0x14   : > { %s1170_s25 = scalar_lea.hbm %s1821_s1, 256 }
  0x15   : > { %p1506_p11 = pnand %p1072_p9, %p1830_p1  ;;  %p1171_p12 = scmp.ne.s32.totalorder %s1821_s1, %s1170_s25 }
  0x16   : > { %p1177_p5 = scmp.lt.u32.totalorder %s1170_s25, %s1821_s1 }
  0x17   : > { %p1172_p13 = pneg %p1506_p11 }
  0x19   : > { %p1173_p0 = pnand %p1172_p13, %p1171_p12 }
  0x1b   : > { %p1174_p3 = pneg %p1173_p0 }
  0x1d   : > { %p1179_p7 = pnand %p1177_p5, %p1174_p3 }
  0x1f   : > { %1182 = shalt.err (!%p1179_p7)
}
  0x20   : > { %s1183_s18 = scalar_lea.vmem %s1499_s19, 256  ;;  %p1191_p2 = scmp.lt.s32.totalorder %s1499_s19, %s1499_s19 }
  0x21   : > { %p1184_p9 = scmp.ne.s32.totalorder %s1499_s19, %s1183_s18  ;;  %p1192_p12 = scmp.lt.s32.totalorder %s1183_s18, %s1183_s18 }
  0x23   : > { %p1186_p10 = pnand %p1184_p9, %p1172_p13  ;;  %p1193_p0 = por %p1192_p12, %p1191_p2 }
  0x25   : > { %p1187_p1 = pneg %p1186_p10 }
  0x27   : > { %p1194_p6 = pnand %p1193_p0, %p1187_p1 }
  0x29   : > { %1197 = shalt.err (!%p1194_p6)
}
  0x2a   : > { %s1390_s21 = smov 64   ;;  %s1391_s23 = smov 4  }
  0x2b   : > { %1075 = dma.hbm_to_vmem [thread:$0]  (!%p1506_p11), %s1821_s1, 256, %s1499_s19, [#allocation6], %s1390_s21, %s1390_s21, %s1391_s23  }
  0x2c   : > { %s1198_s28 = scalar_lea.hbm %s1823_s3, 256 }
  0x2d   : > { %p1199_p2 = scmp.ne.s32.totalorder %s1823_s3, %s1198_s28  ;;  %p1205_p10 = scmp.lt.u32.totalorder %s1198_s28, %s1823_s3 }
  0x2f   : > { %p1201_p1 = pnand %p1199_p2, %p1172_p13 }
  0x31   : > { %p1202_p6 = pneg %p1201_p1 }
  0x33   : > { %p1207_p3 = pnand %p1205_p10, %p1202_p6 }
  0x35   : > { %1210 = shalt.err (!%p1207_p3)
}
  0x36   : > { %s1211_s19 = scalar_lea.vmem %s1510_s22, 256  ;;  %p1219_p12 = scmp.lt.s32.totalorder %s1510_s22, %s1510_s22 }
  0x37   : > { %p1212_p5 = scmp.ne.s32.totalorder %s1510_s22, %s1211_s19  ;;  %p1220_p0 = scmp.lt.s32.totalorder %s1211_s19, %s1211_s19 }
  0x39   : > { %p1214_p7 = pnand %p1212_p5, %p1172_p13  ;;  %p1221_p2 = por %p1220_p0, %p1219_p12 }
  0x3b   : > { %p1215_p9 = pneg %p1214_p7 }
  0x3d   : > { %p1222_p1 = pnand %p1221_p2, %p1215_p9 }
  0x3f   : > { %1225 = shalt.err (!%p1222_p1)
}
  0x40   : > { %1078 = dma.hbm_to_vmem [thread:$0]  (!%p1506_p11), %s1823_s3, 256, %s1510_s22, [#allocation6], %s1390_s21, %s1390_s21, %s1391_s23  }
  0x41   : > { %s1565_s24 = sadd.s32 1, %s1386_s12   ;;  %s37_s20 = sadd.s32 1, %s1382_s11 }
  0x42   : > { %s34_s25 = ssub.s32 %s1386_s12, %s1565_s24  ;;  %p44_p13 = scmp.ne.s32.totalorder %s1382_s11, %s1378_s10 }
  0x43   : > { %p35_p6 = scmp.eq.s32.totalorder %s34_s25, 0  ;;  %p45_p10 = scmp.eq.s32.totalorder %s1386_s12, 0 }
  0x44   : > { %p1843_p3 = scmp.eq.s32.totalorder %s1474_s13, 1  ;;  %p1095_p7 = scmp.lt.s32.totalorder %s1386_s12, 2 }
  0x45   : > { %s1581_s27 = scalar_select %p35_p6, %s1382_s11, %s37_s20  }
  0x46   : > { %p1575_p5 = por %p1843_p3, %p44_p13  ;;  %p46_p9 = por %p45_p10, %p44_p13 }
  0x47   : > { %s316_s28 = sand.u32 1, %s1382_s11   ;;  %s989_s22 = sshll.u32 %s1386_s12, 7 }
  0x48   : > { %s1844_s26 = scalar_select %p1575_p5, 1, 0 }
  0x49   : > { %s988_s29 = sshll.u32 %s316_s28, 3  ;;  %s1845_s0 = sld [smem:[#allocation17_spill]] }
  0x4a   : > { %s320_s19 = scalar_lea.vmem [#allocation2], %s988_s29  ;;  %p1592_p11 = pnand %p1095_p7, %p46_p9 }
  0x4b   : > { %s327_s14 = sshll.u32 %s320_s19, 4  ;;  %s317_s20 = scalar_lea.sflag [#allocation3], %s316_s28  ;;  %s1590_s14 = int_to_ptr.vmem [resolvable:$true] %s327_s14 }
  0x4c   : > { %p1228_p0 = pneg %p1592_p11 }
  0x4f   : > { %s1588_s18 = scalar_lea.hbm %s1845_s0, %s989_s22  ;;  %s1231_s21 = scalar_lea.hbm %s1845_s0, 256 }
  0x50   : > { %s1226_s25 = scalar_lea.hbm %s1588_s18, 128  ;;  %p1232_p13 = scmp.lt.u32.totalorder %s1588_s18, %s1845_s0 }
  0x51   : > { %p1227_p12 = scmp.ne.s32.totalorder %s1588_s18, %s1226_s25  ;;  %p1233_p6 = scmp.lt.u32.totalorder %s1231_s21, %s1226_s25 }
  0x52   : > { %p1235_p3 = scmp.lt.u32.totalorder %s1226_s25, %s1588_s18 }
  0x53   : > { %p1229_p2 = pnand %p1228_p0, %p1227_p12  ;;  %p1234_p10 = por %p1233_p6, %p1232_p13 }
  0x55   : > { %p1230_p1 = pneg %p1229_p2  ;;  %p1236_p7 = por %p1235_p3, %p1234_p10 }
  0x57   : > { %p1237_p9 = pnand %p1236_p7, %p1230_p1 }
  0x59   : > { %1240 = shalt.err (!%p1237_p9)
}
  0x5a   : > { %s1241_s28 = scalar_lea.vmem %s1590_s14, 128  ;;  %s1392_s22 = smov [#allocation2]  }
  0x5b   : > { %p1242_p12 = scmp.ne.s32.totalorder %s1590_s14, %s1241_s28  ;;  %s1246_s29 = sshll.u32 %s1392_s22, 4  ;;  %s1247_s29 = int_to_ptr.vmem [resolvable:$false] %s1246_s29 }
  0x5c   : > { %s1248_s23 = scalar_lea.vmem %s1247_s29, 256  ;;  %p1249_p4 = scmp.lt.s32.totalorder %s1590_s14, %s1247_s29 }
  0x5d   : > { %p1244_p2 = pnand %p1242_p12, %p1228_p0  ;;  %p1250_p13 = scmp.lt.s32.totalorder %s1248_s23, %s1241_s28 }
  0x5f   : > { %p1245_p5 = pneg %p1244_p2  ;;  %p1251_p6 = por %p1250_p13, %p1249_p4 }
  0x61   : > { %p1252_p10 = pnand %p1251_p6, %p1245_p5 }
  0x63   : > { %1255 = shalt.err (!%p1252_p10)
}
  0x64   : > { %1082 = dma.hbm_to_vmem [thread:$0]  (!%p1592_p11), %s1588_s18, 128, %s1590_s14, %s317_s20  }
  0x65   : > { %336 = sbr.rel (%p1495_p8) target bundleno = 628 (0x274), region = 48  ;;  %s1624_s25 = sand.u32 (!%p1495_p8), 1, %s1378_s10  }
  0x66   : > { %s991_s21 = sshll.u32 (!%p1495_p8), %s1624_s25, 3  ;;  %s339_s19 = scalar_lea.sflag (!%p1495_p8), [#allocation3], %s1624_s25 }
  0x67   : > { %s342_s28 = scalar_lea.vmem (!%p1495_p8), [#allocation2], %s991_s21  ;;  %p1847_p4 = scmp.ne.s32.totalorder (!%p1495_p8), %s1838_s15, 0 }
  0x6c   : > { %1357 = dma.done.wait (%p1847_p4), %s339_s19, 128  }
  0x6d   : > { %1359 = vsyncadd (%p1847_p4), %s339_s19, 4294967168  ;;  %p1848_p5 = scmp.eq.s32.totalorder %s1474_s13, 0 }
  0x6f   : > { %1361 = dma.done.wait (%p1848_p5), [#allocation6], 512   ;;  %p1849_p11 = pmov %p1848_p5 }
  0x70   : > { %v1393_v0 = vmov 0.0   ;;  %vm1394_vm0 = vmmov 0   ;;  %v1164_v1 = vld [vmem:[#allocation7] sm:$0xff]   ;;  %v1165_v2 = vld [vmem:[#allocation7 + $0x8] sm:$0xff]   ;;  %v1166_v4 = vld [vmem:[#allocation5] sm:$0xff]   ;;  %vm421_vm1 = vcmask 261120  }
  0x71   : > { %1363 = vsyncadd (%p1849_p11), [#allocation6], 4294966784  ;;  %1040 = vmatprep.subr.bf16.mxu1 %v1393_v0  ;;  %1044 = vmatprep.mubr.msk.bf16.mxu1 %vm1394_vm0, %v1393_v0  ;;  %v396_v3 = vld [vmem:[%s342_s28] sm:$0xff]  ;;  %v1167_v6 = vld [vmem:[#allocation5 + $0x8] sm:$0xff]   ;;  %s1652_s23 = sshll.u32 %s1624_s25, 4  ;;  %s1395_s21 = smov 120  }
  0x72   : > { %1032 = vmatprep.subr.bf16.mxu0 %v1393_v0  ;;  %1036 = vmatprep.mubr.msk.bf16.mxu0 %vm1394_vm0, %v1393_v0  ;;  %v397_v5 = vpack.c.bf16 %v396_v3, %v396_v3  ;;  %v1168_v7 = vld [vmem:[%s1825_s5] sm:$0xff]   ;;  %v1169_v8 = vld [vmem:[%s1825_s5 + $0x8] sm:$0xff]   ;;  %vm605_vm2 = vcmask 60416   ;;  %s1396_s19 = smov 112   ;;  %s1655_s28 = scalar_lea.vmem [#allocation8], %s1652_s23 }
  0x73   : > { %1041 = vmatpush3.bf16.msra.mxu1 %v1164_v1  ;;  %1033 = vmatpush3.bf16.msra.mxu0 %v1166_v4  ;;  %v1001_v9 = vld [vmem:[%s1824_s4] ss:$0 sm:$0xff]  ;;  %s1397_s18 = smov 104   ;;  %s1663_s14 = scalar_lea.vmem [#allocation11], %s1652_s23 }
  0x74   : > { %1042 = vmatprep.subr.bf16.mxu1 %v1393_v0  ;;  %1034 = vmatprep.subr.bf16.mxu0 %v1393_v0  ;;  %v997_v13 = vld [vmem:[%s1822_s2] ss:$0 sm:$0xff]  ;;  %s1668_s16 = scalar_lea.vmem [#allocation9], %s1652_s23  ;;  %s798_s20 = sshll.u32 %s1655_s28, 4  ;;  %s1684_s20 = int_to_ptr.vmem [resolvable:$true] %s798_s20 }
  0x75   : > { %v1005_v22 = vld [vmem:[%s1826_s6] ss:$0 sm:$0xff]  ;;  %s1682_s22 = sshll.u32 %s1474_s13, 8  ;;  %s1256_s15 = scalar_lea.vmem %s1684_s20, 256 }
  0x76   : > { %p1257_p8 = scmp.ne.s32.totalorder %s1684_s20, %s1256_s15  ;;  %p1850_p0 = scmp.ne.s32.totalorder %s1844_s26, 0 }
  0x77   : > { %1043 = vmatpush3.bf16.msra.mxu1 %v1165_v2  ;;  %1035 = vmatpush3.bf16.msra.mxu0 %v1167_v6  ;;  %s1398_s17 = smov [#allocation8]  }
  0x78   : > { %1048 = vmatprep.subr.bf16.mxu0 %v1393_v0  ;;  %p1258_p1 = pnand %p1257_p8, %p1850_p0 }
  0x7a   : > { %1045 = vmatmul.mubr.msk.bf16.vlgmr.msra.gmra.mrb[0].mxu1 %vm421_vm1, %v397_v5  ;;  %1037 = vmatmul.mubr.msk.bf16.vlgmr.msra.gmra.mrb[0].mxu0 %vm421_vm1, %v397_v5  ;;  %p1259_p3 = pneg %p1258_p1 }
  0x7b   : > { %1049 = vmatpush3.bf16.msra.mxu0 %v1168_v7  ;;  %1052 = vmatprep.mubr.msk.bf16.mxu0 %vm1394_vm0, %v1393_v0 }
  0x7c   : > { %1050 = vmatprep.subr.bf16.mxu0 %v1393_v0 }
  0x7f   : > { %1051 = vmatpush3.bf16.msra.mxu0 %v1169_v8 }
  0x82   : > { %1053 = vmatmul.mubr.msk.bf16.vlgmr.msra.gmra.mrb[4].mxu0 %vm421_vm1, %v397_v5 }
 0x14d   : > { %v522_v10 = vpop.f32.mrb[0].mxu1  ;;  %v459_v16 = vpop.f32.mrb[0].mxu0 }
 0x14e   : > { %v523_v11 = vadd.f32 %v1001_v9, %v522_v10  ;;  %v1046_v12 = vpop.f32.mrb[1].mxu1  ;;  %v460_v17 = vadd.f32 %v997_v13, %v459_v16  ;;  %v1038_v18 = vpop.f32.mrb[1].mxu0 }
 0x14f   : > { %v525_v14 = vpop.f32.mrb[2].mxu1  ;;  %v462_v19 = vpop.f32.mrb[2].mxu0 }
 0x150   : > { %661 = vrot.lane.b32.xlu0 %v523_v11, %s1395_s21  ;;  %628 = vxpose.xlu1.b32.start.end [1/1] (short) (narrow) %v523_v11, 8  ;;  %v1047_v15 = vpop.f32.mrb[3].mxu1  ;;  %v601_v20 = vpack.c.bf16 %v460_v17, %v460_v17  ;;  %v1039_v21 = vpop.f32.mrb[3].mxu0 }
 0x152   : > { %606 = vst.msk [vmem:[%s1655_s28] sm:$0xf] %vm605_vm2, %v601_v20 }
 0x154   : > { %696 = vrot.lane.b32.xlu0 %v523_v11, %s1396_s19 }
 0x155   : > { %v585_v23 = vpop.f32.mrb[4].mxu0 }
 0x156   : > { %v586_v24 = vadd.f32 %v1005_v22, %v585_v23  ;;  %v1054_v25 = vpop.f32.mrb[5].mxu0 }
 0x157   : > { %v588_v26 = vpop.f32.mrb[6].mxu0 }
 0x158   : > { %731 = vrot.lane.b32.xlu0 %v523_v11, %s1397_s18  ;;  %v620_v27 = vpack.c.bf16 %v586_v24, %v586_v24  ;;  %v1142_v28 = vpack.i.bf16 %v586_v24, %v460_v17  ;;  %v1055_v29 = vpop.f32.mrb[7].mxu0 }
 0x15a   : > { %624 = vst.msk [vmem:[%s1663_s14] sm:$0xf] %vm605_vm2, %v620_v27 }
 0x15c   : > { %1143 = vrot.lane.b32.xlu0 %v1142_v28, %s1395_s21  ;;  %s1690_s21 = scalar_lea.hbm %s1827_s7, %s1682_s22 }
 0x160   : > { %1148 = vrot.lane.b32.xlu0 %v1142_v28, %s1396_s19 }
 0x16e   : > { %1153 = vrot.lane.b32.xlu1 %v1142_v28, %s1397_s18  ;;  %s1260_s18 = sshll.u32 %s1398_s17, 4  ;;  %s1261_s18 = int_to_ptr.vmem [resolvable:$false] %s1260_s18 }
 0x16f   : > { %s1262_s0 = scalar_lea.vmem %s1261_s18, 512  ;;  %p1263_p7 = scmp.lt.s32.totalorder %s1684_s20, %s1261_s18 }
 0x170   : > { %p1264_p9 = scmp.lt.s32.totalorder %s1262_s0, %s1256_s15 }
 0x172   : > { %p1265_p12 = por %p1264_p9, %p1263_p7 }
 0x174   : > { %p1266_p2 = pnand %p1265_p12, %p1259_p3 }
 0x1c2   : > { %v662_v30 = vpop.permute.xlu0 %661 }
 0x1c6   : > { %v697_v31 = vpop.permute.xlu0 %696 }
 0x1c7   : > { %v1157_v32 = vpack.i.bf16 %v697_v31, %v662_v30 }
 0x1c9   : > { %1158 = vxpose.xlu0.b32.start.end [1/1] (short) (narrow) %v1157_v32, 8 }
 0x1ca   : > { %v732_v33 = vpop.permute.xlu0 %731 }
 0x1cb   : > { %734 = vxpose.xlu1.b32.start.end [1/1] (short) (narrow) %v732_v33, 8 }
 0x1ce   : > { %v1144_v34 = vpop.permute.xlu0 %1143 }
 0x1cf   : > { %v1146_v36 = vunpack.i.h.bf16 %v1144_v34  ;;  %v1145_v37 = vunpack.i.l.bf16 %v1144_v34 }
 0x1d0   : > { %v644_v35 = vpop.trf.xlu1 }
 0x1d1   : > { %v766_v38 = vpack.c.bf16 %v644_v35, %v644_v35  ;;  %v621_v39 = vpack.c.bf16 %v1146_v36, %v1146_v36  ;;  %v602_v40 = vpack.c.bf16 %v1145_v37, %v1145_v37 }
 0x1d2   : > { %v1149_v41 = vpop.permute.xlu0 %1148 }
 0x1d3   : > { %770 = vst.msk [vmem:[%s1668_s16] sm:$0xf] %vm605_vm2, %v766_v38  ;;  %625 = vst.msk [vmem:[%s1663_s14 + $0x4] sm:$0xf] %vm605_vm2, %v621_v39  ;;  %v1151_v42 = vunpack.i.h.bf16 %v1149_v41  ;;  %v1150_v43 = vunpack.i.l.bf16 %v1149_v41 }
 0x1d4   : > { %607 = vst.msk [vmem:[%s1655_s28 + $0x4] sm:$0xf] %vm605_vm2, %v602_v40 }
 0x1d5   : > { %v622_v44 = vpack.c.bf16 %v1151_v42, %v1151_v42  ;;  %v603_v45 = vpack.c.bf16 %v1150_v43, %v1150_v43 }
 0x1d7   : > { %626 = vst.msk [vmem:[%s1663_s14 + $0x8] sm:$0xf] %vm605_vm2, %v622_v44  ;;  %608 = vst.msk [vmem:[%s1655_s28 + $0x8] sm:$0xf] %vm605_vm2, %v603_v45 }
 0x1e0   : > { %v1154_v46 = vpop.permute.xlu1 %1153 }
 0x1e1   : > { %v1156_v47 = vunpack.i.h.bf16 %v1154_v46  ;;  %v1155_v48 = vunpack.i.l.bf16 %v1154_v46 }
 0x1e3   : > { %v623_v49 = vpack.c.bf16 %v1156_v47, %v1156_v47  ;;  %v604_v50 = vpack.c.bf16 %v1155_v48, %v1155_v48 }
 0x1e5   : > { %627 = vst.msk [vmem:[%s1663_s14 + $0xc] sm:$0xf] %vm605_vm2, %v623_v49  ;;  %609 = vst.msk [vmem:[%s1655_s28 + $0xc] sm:$0xf] %vm605_vm2, %v604_v50 }
 0x1e6   : > { %1269 = shalt.err (!%p1266_p2)
}
 0x1e7   : > { %s1270_s28 = scalar_lea.hbm %s1690_s21, 256  ;;  %s1274_s17 = scalar_lea.hbm %s1827_s7, 512 }
 0x1e8   : > { %p1271_p13 = scmp.ne.s32.totalorder %s1690_s21, %s1270_s28  ;;  %p1275_p4 = scmp.lt.u32.totalorder %s1690_s21, %s1827_s7 }
 0x1e9   : > { %p1276_p5 = scmp.lt.u32.totalorder %s1274_s17, %s1270_s28  ;;  %p1278_p8 = scmp.lt.u32.totalorder %s1270_s28, %s1690_s21 }
 0x1ea   : > { %p1272_p6 = pnand %p1271_p13, %p1850_p0 }
 0x1eb   : > { %p1277_p11 = por %p1276_p5, %p1275_p4 }
 0x1ec   : > { %p1273_p10 = pneg %p1272_p6 }
 0x1ed   : > { %p1279_p1 = por %p1278_p8, %p1277_p11 }
 0x1ef   : > { %p1280_p3 = pnand %p1279_p1, %p1273_p10 }
 0x1f1   : > { %1283 = shalt.err (!%p1280_p3)
}
 0x1f2   : > { %s1835_s0 = smov 64   ;;  %s1400_s15 = smov 4  }
 0x1f3   : > { %s1851_s19 = scalar_lea.sflag [#allocation4], %s1624_s25  ;;  %s814_s28 = sshll.u32 %s1668_s16, 4  ;;  %s1726_s28 = int_to_ptr.vmem [resolvable:$true] %s814_s28 }
 0x1f4   : > { %1066 = dma.vmem_to_hbm [thread:$0]  (%p1850_p0), %s1684_s20, 256, %s1690_s21, %s1851_s19, %s1835_s0, %s1835_s0, %s1400_s15  }
 0x1f5   : > { %s779_s29 = sand.u32 1, %s1474_s13   ;;  %s830_s23 = sshll.u32 %s1663_s14, 4  ;;  %s1734_s23 = int_to_ptr.vmem [resolvable:$true] %s830_s23 }
 0x1f6   : > { %s1732_s20 = scalar_lea.hbm %s1828_s8, %s1682_s22  ;;  %s1740_s21 = scalar_lea.hbm %s1829_s9, %s1682_s22 }
 0x1f7   : > { %s1748_s18 = scalar_lea.sflag [#allocation10], %s779_s29  ;;  %s1284_s19 = scalar_lea.vmem %s1726_s28, 256 }
 0x1f8   : > { %p1285_p7 = scmp.ne.s32.totalorder %s1726_s28, %s1284_s19  ;;  %s1401_s25 = smov [#allocation9]  }
 0x1f9   : > { %s1288_s17 = sshll.u32 %s1401_s25, 4  ;;  %s1289_s17 = int_to_ptr.vmem [resolvable:$false] %s1288_s17 }
 0x1fa   : > { %p1286_p9 = pnand %p1285_p7, %p1850_p0  ;;  %s1290_s0 = scalar_lea.vmem %s1289_s17, 512 }
 0x1fb   : > { %p1291_p2 = scmp.lt.s32.totalorder %s1726_s28, %s1289_s17  ;;  %p1292_p13 = scmp.lt.s32.totalorder %s1290_s0, %s1284_s19 }
 0x1fc   : > { %p1287_p12 = pneg %p1286_p9 }
 0x1fd   : > { %p1293_p6 = por %p1292_p13, %p1291_p2 }
 0x1ff   : > { %p1294_p10 = pnand %p1293_p6, %p1287_p12 }
 0x249   : > { %v1159_v51 = vpop.trf.xlu0 }
 0x24a   : > { %v1163_v52 = vunpack.i.h.bf16 %v1159_v51  ;;  %v1160_v53 = vunpack.i.l.bf16 %v1159_v51 }
 0x24b   : > { %v750_v54 = vpop.trf.xlu1 }
 0x24c   : > { %v768_v55 = vpack.c.bf16 %v1163_v52, %v1163_v52  ;;  %v767_v56 = vpack.c.bf16 %v1160_v53, %v1160_v53  ;;  %v769_v57 = vpack.c.bf16 %v750_v54, %v750_v54 }
 0x24e   : > { %772 = vst.msk [vmem:[%s1668_s16 + $0x8] sm:$0xf] %vm605_vm2, %v768_v55  ;;  %771 = vst.msk [vmem:[%s1668_s16 + $0x4] sm:$0xf] %vm605_vm2, %v767_v56 }
 0x24f   : > { %773 = vst.msk [vmem:[%s1668_s16 + $0xc] sm:$0xf] %vm605_vm2, %v769_v57 }
 0x250   : > { %1297 = shalt.err (!%p1294_p10)
}
 0x251   : > { %s1298_s16 = scalar_lea.hbm %s1732_s20, 256  ;;  %s1302_s13 = scalar_lea.hbm %s1828_s8, 512 }
 0x252   : > { %p1299_p4 = scmp.ne.s32.totalorder %s1732_s20, %s1298_s16  ;;  %p1303_p8 = scmp.lt.u32.totalorder %s1732_s20, %s1828_s8 }
 0x253   : > { %p1304_p1 = scmp.lt.u32.totalorder %s1302_s13, %s1298_s16  ;;  %p1306_p7 = scmp.lt.u32.totalorder %s1298_s16, %s1732_s20 }
 0x254   : > { %p1300_p5 = pnand %p1299_p4, %p1850_p0 }
 0x255   : > { %p1305_p3 = por %p1304_p1, %p1303_p8 }
 0x256   : > { %p1301_p11 = pneg %p1300_p5 }
 0x257   : > { %p1307_p9 = por %p1306_p7, %p1305_p3 }
 0x259   : > { %p1308_p12 = pnand %p1307_p9, %p1301_p11 }
 0x25b   : > { %1311 = shalt.err (!%p1308_p12)
}
 0x25c   : > { %s1852_s0 = smov 64   ;;  %s1312_s19 = scalar_lea.vmem %s1734_s23, 256 }
 0x25d   : > { %1067 = dma.vmem_to_hbm [thread:$0]  (%p1850_p0), %s1726_s28, 256, %s1732_s20, %s1748_s18, %s1852_s0, %s1852_s0, %s1400_s15  }
 0x25e   : > { %p1313_p2 = scmp.ne.s32.totalorder %s1734_s23, %s1312_s19  ;;  %s1402_s17 = smov [#allocation11]  }
 0x25f   : > { %s1316_s16 = sshll.u32 %s1402_s17, 4  ;;  %s1317_s16 = int_to_ptr.vmem [resolvable:$false] %s1316_s16 }
 0x260   : > { %p1314_p13 = pnand %p1313_p2, %p1850_p0  ;;  %s1318_s22 = scalar_lea.vmem %s1317_s16, 512 }
 0x261   : > { %p1319_p10 = scmp.lt.s32.totalorder %s1734_s23, %s1317_s16  ;;  %p1320_p4 = scmp.lt.s32.totalorder %s1318_s22, %s1312_s19 }
 0x262   : > { %p1315_p6 = pneg %p1314_p13 }
 0x263   : > { %p1321_p5 = por %p1320_p4, %p1319_p10 }
 0x265   : > { %p1322_p11 = pnand %p1321_p5, %p1315_p6 }
 0x267   : > { %1325 = shalt.err (!%p1322_p11)
}
 0x268   : > { %s1326_s28 = scalar_lea.hbm %s1740_s21, 256  ;;  %s1330_s13 = scalar_lea.hbm %s1829_s9, 512 }
 0x269   : > { %p1327_p8 = scmp.ne.s32.totalorder %s1740_s21, %s1326_s28  ;;  %p1331_p7 = scmp.lt.u32.totalorder %s1740_s21, %s1829_s9 }
 0x26a   : > { %p1332_p9 = scmp.lt.u32.totalorder %s1330_s13, %s1326_s28  ;;  %p1334_p2 = scmp.lt.u32.totalorder %s1326_s28, %s1740_s21 }
 0x26b   : > { %p1328_p1 = pnand %p1327_p8, %p1850_p0 }
 0x26c   : > { %p1333_p12 = por %p1332_p9, %p1331_p7 }
 0x26d   : > { %p1329_p3 = pneg %p1328_p1 }
 0x26e   : > { %p1335_p13 = por %p1334_p2, %p1333_p12 }
 0x270   : > { %p1336_p6 = pnand %p1335_p13, %p1329_p3 }
 0x272   : > { %1339 = shalt.err (!%p1336_p6)
}
 0x273   : > { %1068 = dma.vmem_to_hbm [thread:$0]  (%p1850_p0), %s1734_s23, 256, %s1740_s21, %s1748_s18, %s1852_s0, %s1852_s0, %s1400_s15  }
 0x274 PF: > { %s1853_s19 = sld [smem:[#allocation16_spill]]  ;;  %s845_s17 = sand.u32 1, %s1374_s30  }
 0x275   : > { %p1855_p4 = scmp.ge.s32.totalorder %s1386_s12, 2  ;;  %s846_s16 = scalar_lea.sflag [#allocation4], %s845_s17 }
 0x27a   : > { %p1854_p10 = scmp.ne.s32.totalorder %s1853_s19, 0 }
 0x27c   : > { %p1084_p5 = pnand %p1855_p4, %p1854_p10 }
 0x27e   : > { %1365 = dma.done.wait (!%p1084_p5), %s846_s16, 256  }
 0x27f   : > { %1367 = vsyncadd (!%p1084_p5), %s846_s16, 4294967040  ;;  %s1856_s26 = sadd.s32 4294967294, %s1386_s12  }
 0x280   : > { %s854_s22 = sand.u32 1, %s1856_s26  }
 0x281   : > { %s855_s28 = scalar_lea.sflag [#allocation10], %s854_s22 }
 0x282   : > { %1369 = dma.done.wait (!%p1084_p5), %s855_s28, 512  }
 0x283   : > { %1371 = vsyncadd (!%p1084_p5), %s855_s28, 4294966784  ;;  %p27_p0 = scmp.ge.s32.totalorder %s1565_s24, 4   ;;  %s1857_s30 = smov %s1378_s10 }
 0x284   : > { %s1858_s10 = smov %s1382_s11  ;;  %s1859_s11 = smov %s1581_s27 }
 0x285   : > { %s1860_s12 = smov %s1565_s24  ;;  %29 = sbr.rel (!%p27_p0) target bundleno = 10 (0xa), region = 133 }
 0x28c   :  { %869 = vsyncpa [#allocation3], 1 }
 0x28d   :  { %871 = vsyncpa [#allocation3 + $0x1], 1 }
 0x28e   :  { %872 = vsyncpa [#allocation6], 1 }
 0x28f   :  { %873 = vsyncpa [#allocation4], 1 }
 0x290   :  { %875 = vsyncpa [#allocation4 + $0x1], 1 }
 0x291   :  { %876 = vsyncpa [#allocation10], 1 }
 0x292   :  { %878 = vsyncpa [#allocation10 + $0x1], 1 }

</bundles_post_ra>
